<compile_context>
chip_gen: v5e
topology: v5e:2x2
jax: 0.10.0
libtpu: 0.0.40
codegen_flags: <defaults>
</compile_context>

<pallas_src>
import jax
import jax.numpy as jnp
from jax.experimental import pallas as pl
from jax.experimental.pallas import tpu as pltpu


def _round_up(x, m):
    return (x + m - 1) // m * m


def _cdiv(a, b):
    return -(-a // b)


def _vmem_capacity_bytes():
    """Physical VMEM per TensorCore; conservative 64 MiB fallback (v7x)."""
    try:
        cap = int(getattr(pltpu.get_tpu_info(), "vmem_capacity_bytes", 0) or 0)
        if cap >= (32 << 20):
            return cap
    except Exception:
        pass
    return 64 << 20


def _make_ca_kernel(return_atte):
    def kernel(x_ref, w1_ref, w2_ref, out_ref, *atte_refs):
        # x_ref:   (C, T)   channels x pixel tile (native dtype; MXU-friendly)
        # w1_ref:  (Cr, C)  first 1x1 conv weight (out, in), no bias
        # w2_ref:  (C, Cr)  second 1x1 conv weight (out, in), no bias
        x = x_ref[...]
        w1 = w1_ref[...]
        w2 = w2_ref[...]

        y = jnp.dot(w1, x, preferred_element_type=jnp.float32)       # (Cr, T)
        y = jnp.maximum(y, 0.0)                                        # ReLU
        z = jnp.dot(w2, y.astype(w2.dtype),
                    preferred_element_type=jnp.float32)                # (C, T)
        atte = jax.nn.sigmoid(z)                                       # EUP

        out_ref[...] = (x.astype(jnp.float32) * atte).astype(out_ref.dtype)
        if return_atte:
            atte_refs[0][...] = atte.astype(atte_refs[0].dtype)

    return kernel


def ca_layer(x_nchw, w1, w2, *, t_pix=None, atte_dtype=None, return_atte=True):
    """CALayer forward.

    x_nchw : (N, C, H, W)
    w1     : (C//r, C, 1, 1)   first 1x1 conv weight (no bias)
    w2     : (C, C//r, 1, 1)   second 1x1 conv weight (no bias)
    returns (inp * atte, atte) if return_atte else inp * atte, NCHW layout.
    """
    N, C, H, W = x_nchw.shape
    Cr = w1.shape[0]
    assert w1.shape == (Cr, C, 1, 1) and w2.shape == (C, Cr, 1, 1)

    HW = H * W
    in_dtype = jnp.dtype(x_nchw.dtype)
    out_dtype = in_dtype
    atte_dtype = jnp.dtype(out_dtype if atte_dtype is None else atte_dtype)

    in_bytes = in_dtype.itemsize
    out_bytes = jnp.dtype(out_dtype).itemsize
    atte_bytes = atte_dtype.itemsize if return_atte else 0

    vmem_cap = _vmem_capacity_bytes()

    # Per-pixel-column VMEM footprint:
    #   double-buffered HBM stream blocks (in + out [+ atte]) ...
    stream_per_col = 2 * C * (in_bytes + out_bytes + atte_bytes)
    #   ... plus f32 intermediates Mosaic materializes (z / atte / product /
    #   possible x upcast ~= 4 x C rows, plus y with Cr rows).
    scratch_per_col = 4 * (4 * C + Cr)
    per_col = stream_per_col + scratch_per_col

    # ---- pixel-tile size: mem-bound, so go as big as the VMEM budget allows.
    if t_pix is None:
        budget = int(vmem_cap * 0.45)               # generation-aware target
        cap = max(128, (budget // per_col) // 128 * 128)
        t_pix = min(cap, 32768, _round_up(HW, 128))
        # keep >= ~4 grid steps (pipeline depth x 2 TCs on v7x) when possible
        min_steps = 4
        if N * _cdiv(HW, t_pix) < min_steps and HW > 128:
            tiles_per_img = max(1, _cdiv(min_steps, N))
            t_pix = max(128, _round_up(_cdiv(HW, tiles_per_img), 128))
        # balance tiles so the ragged last block isn't pathologically small
        n_tiles = _cdiv(HW, t_pix)
        t_pix = _round_up(_cdiv(HW, n_tiles), 128)
    else:
        t_pix = max(128, (t_pix // 128) * 128)

    # NCHW -> (N, C, HW): pure reshape, no transpose, no padding HBM pass.
    x3d = x_nchw.reshape(N, C, HW)

    # Weights: (out, in) used natively; pre-cast once on the host so no
    # per-grid-step cast work remains in the kernel loop.
    w_dtype = in_dtype if in_dtype == jnp.bfloat16 else jnp.float32
    w1m = w1.reshape(Cr, C).astype(w_dtype)
    w2m = w2.reshape(C, Cr).astype(w_dtype)

    grid = (N, _cdiv(HW, t_pix))

    blk = lambda n, j: (n, 0, j)
    x_spec = pl.BlockSpec((None, C, t_pix), blk)
    o_spec = pl.BlockSpec((None, C, t_pix), blk)
    w1_spec = pl.BlockSpec((Cr, C), lambda n, j: (0, 0))
    w2_spec = pl.BlockSpec((C, Cr), lambda n, j: (0, 0))

    if return_atte:
        out_shape = (jax.ShapeDtypeStruct((N, C, HW), out_dtype),
                     jax.ShapeDtypeStruct((N, C, HW), atte_dtype))
        out_specs = [o_spec, o_spec]
    else:
        out_shape = jax.ShapeDtypeStruct((N, C, HW), out_dtype)
        out_specs = o_spec

    # Advisory cost estimate: tiny-contraction matmuls; HBM-bandwidth bound.
    m_pix = N * HW
    cost = pl.CostEstimate(
        flops=4 * m_pix * C * Cr + 3 * m_pix * C,
        transcendentals=m_pix * C,
        bytes_accessed=m_pix * C * (in_bytes + out_bytes + atte_bytes)
        + 2 * C * Cr * 4,
    )

    # Scoped-VMEM limit: actual footprint (streams + f32 scratch) + weights +
    # headroom, clamped to 90% of device capacity (safe on v7x's 64 MiB).
    vmem_need = per_col * t_pix + 16 * C * Cr * 4 + (6 << 20)
    vmem_limit = int(min(max(vmem_need, 32 << 20), int(vmem_cap * 0.9)))

    result = pl.pallas_call(
        _make_ca_kernel(return_atte),
        out_shape=out_shape,
        grid_spec=pltpu.PrefetchScalarGridSpec(
            num_scalar_prefetch=0,
            grid=grid,
            in_specs=[x_spec, w1_spec, w2_spec],
            out_specs=out_specs,
        ),
        compiler_params=pltpu.CompilerParams(
            dimension_semantics=("parallel", "parallel"),
            vmem_limit_bytes=vmem_limit,
        ),
        cost_estimate=cost,
    )(x3d, w1m, w2m)

    if return_atte:
        out3d, atte3d = result
        return out3d.reshape(N, C, H, W), atte3d.reshape(N, C, H, W)
    return result.reshape(N, C, H, W)


def _reference(x_nchw, w1, w2):
    # Pure-JAX reference (1x1 conv == einsum over the channel axis).
    Cr, C = w1.shape[0], w1.shape[1]
    hi = jax.lax.Precision.HIGHEST
    y = jnp.einsum('nchw,oc->nohw', x_nchw, w1.reshape(Cr, C), precision=hi)
    y = jnp.maximum(y, 0.0)
    z = jnp.einsum('nchw,oc->nohw', y, w2.reshape(C, Cr), precision=hi)
    atte = jax.nn.sigmoid(z)
    return x_nchw * atte, atte


if __name__ == "__main__":
    def _run_case(key, N, C, H, W, reduction):
        Cr = max(1, C // reduction)
        kx, k1, k2 = jax.random.split(key, 3)
        x = jax.random.normal(kx, (N, C, H, W), dtype=jnp.float32)
        w1 = jax.random.normal(k1, (Cr, C, 1, 1), dtype=jnp.float32) * 0.1
        w2 = jax.random.normal(k2, (C, Cr, 1, 1), dtype=jnp.float32) * 0.1

        out, atte = ca_layer(x, w1, w2)
        out = jax.block_until_ready(out)
        atte = jax.block_until_ready(atte)

        ref_out, ref_atte = _reference(x, w1, w2)
        assert jnp.allclose(out, ref_out, atol=1e-5, rtol=1e-5)
        assert jnp.allclose(atte, ref_atte, atol=1e-5, rtol=1e-5)

        # out-only path (skips the atte HBM write) must agree too
        out_only = jax.block_until_ready(ca_layer(x, w1, w2, return_atte=False))
        assert jnp.allclose(out_only, ref_out, atol=1e-5, rtol=1e-5)

    key = jax.random.PRNGKey(0)
    ka, kb, kc = jax.random.split(key, 3)
    # CALayer(channel=32, reduction=16); H*W aligned to the lane tile
    _run_case(ka, N=2, C=32, H=16, W=16, reduction=16)
    # H*W = 63 < 128: single partial block, no host pad / no output slice
    _run_case(kb, N=1, C=4, H=7, W=9, reduction=2)
    # H*W = 143: multiple tiles with a ragged (clipped) last block
    _run_case(kc, N=2, C=8, H=11, W=13, reduction=4)

    print("KERNEL_OK")
</pallas_src>

<mosaic_0001>
module attributes {stable_mosaic.version = 11 : i64} {
  func.func @kernel(%arg0: i32, %arg1: i32, %arg2: memref<1x32x128xf32, #tpu.memory_space<vmem>>, %arg3: memref<2x32xf32, #tpu.memory_space<vmem>>, %arg4: memref<32x2xf32, #tpu.memory_space<vmem>>, %arg5: memref<1x32x128xf32, #tpu.memory_space<vmem>>, %arg6: memref<1x32x128xf32, #tpu.memory_space<vmem>>) attributes {dimension_semantics = [#tpu.dimension_semantics<parallel>, #tpu.dimension_semantics<parallel>], iteration_bounds = array<i64: 2, 2>, scalar_prefetch = 0 : i64, scratch_operands = 0 : i64, tpu.core_type = #tpu.core_type<tc>, window_params = [{transform_indices = @transform_0, window_bounds = array<i64: 1, 32, 128>}, {pipeline_mode = #tpu.pipeline_mode<synchronous>, transform_indices = @transform_1, window_bounds = array<i64: 2, 32>}, {pipeline_mode = #tpu.pipeline_mode<synchronous>, transform_indices = @transform_2, window_bounds = array<i64: 32, 2>}, {transform_indices = @transform_3, window_bounds = array<i64: 1, 32, 128>}, {transform_indices = @transform_4, window_bounds = array<i64: 1, 32, 128>}]} {
    %c0 = arith.constant 0 : index
    %c0_0 = arith.constant 0 : index
    %c0_1 = arith.constant 0 : index
    %0 = vector.load %arg2[%c0, %c0_0, %c0_1] : memref<1x32x128xf32, #tpu.memory_space<vmem>>, vector<1x32x128xf32>
    %1 = vector.shape_cast %0 : vector<1x32x128xf32> to vector<32x128xf32>
    %c0_2 = arith.constant 0 : index
    %c0_3 = arith.constant 0 : index
    %2 = vector.load %arg3[%c0_2, %c0_3] : memref<2x32xf32, #tpu.memory_space<vmem>>, vector<2x32xf32>
    %c0_4 = arith.constant 0 : index
    %c0_5 = arith.constant 0 : index
    %3 = vector.load %arg4[%c0_4, %c0_5] : memref<32x2xf32, #tpu.memory_space<vmem>>, vector<32x2xf32>
    %cst = arith.constant dense<0.000000e+00> : vector<2x128xf32>
    %4 = tpu.matmul %2, %1, %cst {dimension_numbers = #tpu.dot_dimension_numbers<[1], [0], [0], [1], [0, 0, 1, 1], [], []>} : vector<2x32xf32>, vector<32x128xf32>, vector<2x128xf32> -> vector<2x128xf32>
    %cst_6 = arith.constant 0.000000e+00 : f32
    %5 = vector.broadcast %cst_6 : f32 to vector<2x128xf32>
    %6 = arith.maximumf %4, %5 : vector<2x128xf32>
    %cst_7 = arith.constant dense<0.000000e+00> : vector<32x128xf32>
    %7 = tpu.matmul %3, %6, %cst_7 {dimension_numbers = #tpu.dot_dimension_numbers<[1], [0], [0], [1], [0, 0, 1, 1], [], []>} : vector<32x2xf32>, vector<2x128xf32>, vector<32x128xf32> -> vector<32x128xf32>
    %8 = arith.negf %7 : vector<32x128xf32>
    %9 = math.exp %8 : vector<32x128xf32>
    %cst_8 = arith.constant 1.000000e+00 : f32
    %10 = vector.broadcast %cst_8 : f32 to vector<32x128xf32>
    %11 = arith.addf %10, %9 : vector<32x128xf32>
    %12 = arith.divf %10, %11 : vector<32x128xf32>
    %13 = arith.mulf %1, %12 : vector<32x128xf32>
    %c0_9 = arith.constant 0 : index
    %c0_10 = arith.constant 0 : index
    %c0_11 = arith.constant 0 : index
    %14 = vector.load %arg5[%c0_9, %c0_10, %c0_11] : memref<1x32x128xf32, #tpu.memory_space<vmem>>, vector<1x32x128xf32>
    %15 = vector.shape_cast %14 : vector<1x32x128xf32> to vector<32x128xf32>
    %16 = vector.shape_cast %13 : vector<32x128xf32> to vector<1x32x128xf32>
    tpu.vector_store %arg5[%c0_9, %c0_10, %c0_11], %16 {strides = array<i32>} : memref<1x32x128xf32, #tpu.memory_space<vmem>>, vector<1x32x128xf32>,
    %c0_12 = arith.constant 0 : index
    %c0_13 = arith.constant 0 : index
    %c0_14 = arith.constant 0 : index
    %17 = vector.load %arg6[%c0_12, %c0_13, %c0_14] : memref<1x32x128xf32, #tpu.memory_space<vmem>>, vector<1x32x128xf32>
    %18 = vector.shape_cast %17 : vector<1x32x128xf32> to vector<32x128xf32>
    %19 = vector.shape_cast %12 : vector<32x128xf32> to vector<1x32x128xf32>
    tpu.vector_store %arg6[%c0_12, %c0_13, %c0_14], %19 {strides = array<i32>} : memref<1x32x128xf32, #tpu.memory_space<vmem>>, vector<1x32x128xf32>,
    return
  }
  func.func @transform_0(%arg0: i32, %arg1: i32) -> (i32, i32, i32) {
    %c0_i32 = arith.constant 0 : i32
    %c0_i32_0 = arith.constant 0 : i32
    return %arg0, %c0_i32, %arg1 : i32, i32, i32
  }
  func.func @transform_1(%arg0: i32, %arg1: i32) -> (i32, i32) {
    %c0_i32 = arith.constant 0 : i32
    %c0_i32_0 = arith.constant 0 : i32
    %c0_i32_1 = arith.constant 0 : i32
    return %c0_i32, %c0_i32_0 : i32, i32
  }
  func.func @transform_2(%arg0: i32, %arg1: i32) -> (i32, i32) {
    %c0_i32 = arith.constant 0 : i32
    %c0_i32_0 = arith.constant 0 : i32
    %c0_i32_1 = arith.constant 0 : i32
    return %c0_i32, %c0_i32_0 : i32, i32
  }
  func.func @transform_3(%arg0: i32, %arg1: i32) -> (i32, i32, i32) {
    %c0_i32 = arith.constant 0 : i32
    %c0_i32_0 = arith.constant 0 : i32
    return %arg0, %c0_i32, %arg1 : i32, i32, i32
  }
  func.func @transform_4(%arg0: i32, %arg1: i32) -> (i32, i32, i32) {
    %c0_i32 = arith.constant 0 : i32
    %c0_i32_0 = arith.constant 0 : i32
    return %arg0, %c0_i32, %arg1 : i32, i32, i32
  }
}

</mosaic_0001>

<bundles_post_ra>
// kernel: tpu_custom_call.1
= control target key start
LH: loop header
LB: loop body
LE: loop exit
PB: predicated region body
PF: predicated region fallthrough
CT: control target
= control target key end

     0   :  { %10 = vsyncpa [#allocation3], 0  ;;  %s1141_s0 = inlined_call_operand.hbm [shape: f32[2,32,256], index: 0, kind: input, shape index: {}]   ;;  %s1142_s1 = inlined_call_operand.vmem [shape: f32[2,32], index: 1, kind: input, shape index: {}]   ;;  %s1143_s2 = inlined_call_operand.vmem [shape: f32[32,2], index: 2, kind: input, shape index: {}]   ;;  %s1144_s3 = inlined_call_operand.hbm [shape: f32[2,32,256], index: 3, kind: output, shape index: {0}]   ;;  %s1145_s4 = inlined_call_operand.hbm [shape: f32[2,32,256], index: 4, kind: output, shape index: {1}]  }
   0x1   :  { %12 = vsyncpa [#allocation3 + $0x1], 0 }
   0x2   :  { %13 = vsyncpa [#allocation4], 0 }
   0x3   :  { %15 = vsyncpa [#allocation4 + $0x1], 0 }
   0x4   :  { %16 = vsyncpa [#allocation7], 0 }
   0x5   :  { %18 = vsyncpa [#allocation7 + $0x1], 0  ;;  %s908_s15 = smov 0   ;;  %s910_s16 = smov 0  }
   0x6   :  { %s912_s17 = smov 0   ;;  %s914_s18 = smov 0  }
   0x7   :  { %s916_s19 = smov 0   ;;  %s918_s20 = smov 0  }
   0x8   :  { %s920_s21 = smov 0   ;;  %s922_s22 = smov 0  }
   0x9 LB: > { %1149 = sst [smem:[#allocation11_spill]] %s855_s17  ;;  %s579_s23 = sadd.s32 4294967295, %s875_s22   ;;  %s875_s22 = sphi %s922_s22, %s24_s22   ;;  %s871_s21 = sphi %s920_s21, %s1168_s21   ;;  %s867_s20 = sphi %s918_s20, %s1167_s20   ;;  %s863_s19 = sphi %s916_s19, %s1166_s19   ;;  %s859_s18 = sphi %s914_s18, %s1165_s18   ;;  %s855_s17 = sphi %s912_s17, %s1160_s17   ;;  %s851_s16 = sphi %s910_s16, %s1164_s16   ;;  %s847_s15 = sphi %s908_s15, %s1163_s15  }
   0xa   : > { %s580_s24 = sadd.s32 4294967294, %s875_s22   ;;  %s33_s25 = sadd.s32 1, %s867_s20 }
   0xb   : > { %s36_s26 = sadd.s32 1, %s871_s21  ;;  %p34_p0 = scmp.ge.s32.totalorder %s33_s25, 2 }
   0xc   : > { %s45_s27 = sadd.s32 1, %s855_s17  ;;  %p52_p1 = scmp.ne.s32.totalorder %s855_s17, %s851_s16 }
   0xd   : > { %p53_p2 = scmp.eq.s32.totalorder %s875_s22, 0  ;;  %s1170_s25 = smov (%p34_p0, %s33_s25), 0 }
   0xe   : > { %1150 = sst [smem:[#allocation12_spill]] %s1170_s25  ;;  %s1172_s26 = smov (!%p34_p0, %s36_s26), %s871_s21 }
   0xf   : > { %s41_s28 = ssub.s32 %s867_s20, %s1170_s25  ;;  %p961_p3 = por %p53_p2, %p52_p1 }
  0x10   : > { %p38_p4 = scmp.ge.s32.totalorder %s1172_s26, 2  ;;  %p58_p5 = scmp.ne.s32.totalorder %s851_s16, %s847_s15 }
  0x11   : > { %p59_p6 = scmp.eq.s32.totalorder %s579_s23, 0  ;;  %p126_p7 = scmp.eq.s32.totalorder %s579_s23, 3 }
  0x12   : > { %s1174_s26 = smov (%p38_p4, %s1172_s26), 0  ;;  %p132_p10 = scmp.eq.s32.totalorder %s580_s24, 3 }
  0x13   : > { %1152 = sst [smem:[#allocation13_spill]] %s1174_s26  ;;  %p969_p8 = por %p59_p6, %p58_p5 }
  0x14   : > { %p973_p9 = por %p126_p7, %p52_p1  ;;  %s40_s6 = ssub.s32 %s871_s21, %s1174_s26 }
  0x15   : > { %s42_s7 = sor.u32 %s41_s28, %s40_s6  ;;  %p979_p12 = por %p132_p10, %p58_p5 }
  0x16   : > { %p43_p11 = scmp.eq.s32.totalorder %s42_s7, 0  ;;  %p627_p13 = scmp.lt.s32.totalorder %s875_s22, 4 }
  0x17   : > { %s186_s9 = sand.u32 1, %s855_s17   ;;  %s584_s12 = sshll.u32 %s871_s21, 3 }
  0x18   : > { %s986_s10 = scalar_select %p43_p11, %s855_s17, %s45_s27  }
  0x19   : > { %s583_s11 = sshll.u32 %s186_s9, 5  ;;  %s194_s13 = sadd.s32 %s867_s20, %s584_s12 }
  0x1a   : > { %1156 = sst [smem:[#allocation14_spill]] %s986_s10  ;;  %s190_s14 = scalar_lea.vmem [#allocation2], %s583_s11 }
  0x1b   : > { %s199_s23 = sshll.u32 %s190_s14, 4  ;;  %s585_s26 = sshll.u32 %s194_s13, 3  ;;  %s200_s23 = int_to_ptr.vmem [resolvable:$true] %s199_s23 }
  0x1c   : > { %s196_s6 = scalar_lea.hbm %s1141_s0, %s585_s26  ;;  %p617_p0 = pnand %p627_p13, %p961_p3 }
  0x1d   : > { %s197_s7 = sshll.u32 %s196_s6, 4  ;;  %s187_s25 = scalar_lea.sflag [#allocation3], %s186_s9  ;;  %s198_s7 = int_to_ptr.hbm [resolvable:$true] %s197_s7 }
  0x1e   : > { %s877_s27 = smov 256   ;;  %s878_s10 = smov 128  }
  0x1f   : > { %s879_s17 = smov 8   ;;  %p586_p1 = scmp.ge.s32.totalorder %s875_s22, 1 }
  0x20   : > { %619 = dma.hbm_to_vmem [thread:$0]  (!%p617_p0), %s198_s7, 512, %s200_s23, %s187_s25, %s877_s27, %s878_s10, %s879_s17  }
  0x21   : > { %p207_p2 = scmp.lt.s32.totalorder %s875_s22, 5 }
  0x23   : > { %p208_p4 = pnand %p586_p1, %p207_p2 }
  0x24   : > { %s998_s11 = sand.u32 (!%p208_p4), 1, %s851_s16  }
  0x25   : > { %211 = sbr.rel (%p208_p4) target bundleno = 365 (0x16d), region = 32  ;;  %s1001_s26 = sshll.u32 (!%p208_p4), %s998_s11, 5 }
  0x26   : > { %s214_s29 = scalar_lea.sflag (!%p208_p4), [#allocation3], %s998_s11  ;;  %s217_s12 = scalar_lea.vmem (!%p208_p4), [#allocation2], %s1001_s26 }
  0x2a   : > { %834 = dma.done.wait (%p969_p8), %s214_s29, 512  }
  0x2b   : > { %836 = vsyncadd (%p969_p8), %s214_s29, 4294966784  ;;  %v1009_v0 = vld [vmem:[%s217_s12 + $0x18] sm:$0xff]  ;;  %v1011_v1 = vld [vmem:[%s217_s12 + $0x10] sm:$0xff]  ;;  %vm257_vm0 = vcmask 261120   ;;  %vm295_vm1 = vcmask 1041408   ;;  %vm282_vm2 = vcmask 15360  }
  0x2c   : > { %273 = vmatpush.msra.mxu0 %v1009_v0  ;;  %v1014_v2 = vld [vmem:[%s217_s12 + $0x8] sm:$0xff]  ;;  %v1017_v3 = vld [vmem:[%s217_s12] sm:$0xff]  ;;  %v256_v8 = vld [vmem:[%s1143_s2 + $0x18] sm:$0xff]  ;;  %s602_s6 = sshll.u32 %s863_s19, 3  ;;  %s1051_s19 = scalar_lea.vmem [#allocation6], %s1001_s26 }
  0x2d   : > { %v252_v4 = vld [vmem:[%s1142_s1] sm:$0x3]  ;;  %v254_v7 = vld [vmem:[%s1143_s2 + $0x8] sm:$0xff]  ;;  %v255_v10 = vld [vmem:[%s1143_s2 + $0x10] sm:$0xff]  ;;  %s1047_s7 = sadd.s32 %s859_s18, %s602_s6  ;;  %s1056_s18 = scalar_lea.vmem [#allocation5], %s1001_s26 }
  0x2e   : > { %274 = vmatpush.msra.mxu0 %v1011_v1  ;;  %v253_v9 = vld [vmem:[%s1143_s2] sm:$0xff]  ;;  %s603_s27 = sshll.u32 %s1047_s7, 3  ;;  %s435_s9 = sshll.u32 %s1056_s18, 4  ;;  %s1083_s9 = int_to_ptr.vmem [resolvable:$true] %s435_s9 }
  0x2f   : > { %s1064_s12 = scalar_lea.hbm %s1144_s3, %s603_s27  ;;  %s452_s30 = scalar_lea.hbm %s1145_s4, %s603_s27 }
  0x30   : > { %275 = vmatpush.msra.mxu0 %v1014_v2  ;;  %s437_s10 = sshll.u32 %s1064_s12, 4  ;;  %s453_s13 = sshll.u32 %s1051_s19, 4  ;;  %s454_s13 = int_to_ptr.vmem [resolvable:$true] %s453_s13  ;;  %s1085_s10 = int_to_ptr.hbm [resolvable:$true] %s437_s10 }
  0x31   : > { %s455_s14 = sshll.u32 %s452_s30, 4  ;;  %s422_s23 = scalar_lea.sflag [#allocation7], %s998_s11  ;;  %s456_s14 = int_to_ptr.hbm [resolvable:$true] %s455_s14 }
  0x32   : > { %276 = vmatpush.msra.mxu0 %v1017_v3  ;;  %s759_s24 = sshra.s32 %s456_s14, 4  ;;  %s765_s27 = scalar_lea.hbm %s1145_s4, 128  ;;  %s760_s24 = int_to_ptr.hbm [resolvable:$true] %s759_s24 }
  0x33   : > { %590 = vmatmul.msk.f32.vlgmr.msra.gmra.mxu0 %vm257_vm0, %v252_v4  ;;  %s761_s28 = scalar_lea.hbm %s760_s24, 32  ;;  %p766_p7 = scmp.lt.s32.totalorder %s760_s24, %s1145_s4 }
  0x34   : > { %p762_p3 = scmp.ne.s32.totalorder %s760_s24, %s761_s28  ;;  %p767_p8 = scmp.lt.s32.totalorder %s765_s27, %s761_s28 }
  0x36   : > { %p763_p5 = pnand %p762_p3, %p973_p9  ;;  %p768_p10 = por %p767_p8, %p766_p7 }
  0x38   : > { %p764_p6 = pneg %p763_p5 }
  0x3a   : > { %p769_p11 = pnand %p768_p10, %p764_p6 }
  0xb0   : > { %v278_v5 = vpop.f32.mrf.mxu0 }
  0xb1   : > { %v281_v6 = vmax.f32 %v278_v5, 0.0 }
  0xb3   : > { %591 = vmatpush.msk.msra.mxu1 %vm295_vm1, %v281_v6  ;;  %608 = vmatpush.msk.msra.mxu2 %vm295_vm1, %v281_v6 }
  0xb4   : > { %609 = vmatpush.msk.msra.mxu3 %vm295_vm1, %v281_v6  ;;  %593 = vmatmul.msk.f32.vlgmr.msra.gmra.mxu2 %vm282_vm2, %v254_v7 }
  0xb5   : > { %595 = vmatmul.msk.f32.vlgmr.msra.gmra.mxu3 %vm282_vm2, %v256_v8  ;;  %592 = vmatmul.msk.f32.vlgmr.msra.gmra.mxu1 %vm282_vm2, %v253_v9 }
  0xbc   : > { %594 = vmatmul.msk.f32.gmra.mxu2 %vm282_vm2, %v255_v10 }
 0x132   : > { %v316_v11 = vpop.f32.mrf.mxu1 }
 0x133   : > { %v596_v12 = vmul.f32 -1.442695, %v316_v11 }
 0x135   : > { %699 = vpow2.f32 %v596_v12 }
 0x137   : > { %v319_v13 = vpop.f32.mrf.mxu2 }
 0x138   : > { %v597_v14 = vmul.f32 -1.442695, %v319_v13  ;;  %v325_v15 = vpop.f32.mrf.mxu3 }
 0x139   : > { %v599_v16 = vmul.f32 -1.442695, %v325_v15 }
 0x13a   : > { %701 = vpow2.f32 %v597_v14 }
 0x13b   : > { %v700_v17 = vpop.eup %699  ;;  %703 = vpow2.f32 %v599_v16 }
 0x13c   : > { %v340_v18 = vadd.f32 1.0, %v700_v17 }
 0x13e   : > { %705 = vrcp.f32 %v340_v18  ;;  %v355_v27 = vand.u32 2147483648, %v340_v18  ;;  %vm349_vm3 = vweird.f32 %v340_v18  ;;  %v353_v29 = vand.u32 2147483647, %v340_v18 }
 0x13f   : > { %v322_v19 = vpop.f32.mrf.mxu2 }
 0x140   : > { %v702_v20 = vpop.eup %701  ;;  %v598_v21 = vmul.f32 -1.442695, %v322_v19  ;;  %v356_v36 = vor.u32 1.1754944e-38, %v355_v27  ;;  %vm354_vm6 = vcmp.eq.f32.partialorder %v353_v29, 8.507059e+37 }
 0x141   : > { %v704_v22 = vpop.eup %703  ;;  %v341_v23 = vadd.f32 1.0, %v702_v20 }
 0x142   : > { %v343_v24 = vadd.f32 1.0, %v704_v22  ;;  %707 = vpow2.f32 %v598_v21 }
 0x143   : > { %709 = vrcp.f32 %v341_v23  ;;  %v368_v41 = vand.u32 2147483647, %v341_v23  ;;  %v370_v43 = vand.u32 2147483648, %v341_v23  ;;  %vm364_vm10 = vweird.f32 %v341_v23 }
 0x144   : > { %v706_v25 = vpop.eup %705  ;;  %711 = vrcp.f32 %v343_v24  ;;  %vm394_vm7 = vweird.f32 %v343_v24  ;;  %v400_v47 = vand.u32 2147483648, %v343_v24  ;;  %v398_v50 = vand.u32 2147483647, %v343_v24 }
 0x145   : > { %v345_v26 = vmul.f32 %v706_v25, %v340_v18  ;;  %vm350_vm4 = vweird.f32 %v706_v25  ;;  %v371_v53 = vor.u32 1.1754944e-38, %v370_v43  ;;  %vm369_vm12 = vcmp.eq.f32.partialorder %v368_v41, 8.507059e+37 }
 0x146   : > { %vm1038_vm5 = vmor %vm349_vm3, %vm350_vm4  ;;  %v401_v56 = vor.u32 1.1754944e-38, %v400_v47  ;;  %vm399_vm14 = vcmp.eq.f32.partialorder %v398_v50, 8.507059e+37 }
 0x147   : > { %v346_v28 = vsub.f32 1.0, %v345_v26 }
 0x148   : > { %v708_v30 = vpop.eup %707 }
 0x149   : > { %v710_v31 = vpop.eup %709  ;;  %v347_v32 = vmul.f32 %v706_v25, %v346_v28  ;;  %v1036_v33 = vadd.f32 1.0, %v708_v30 }
 0x14a   : > { %v712_v34 = vpop.eup %711  ;;  %v360_v37 = vmul.f32 %v710_v31, %v341_v23  ;;  %vm365_vm8 = vweird.f32 %v710_v31 }
 0x14b   : > { %v348_v38 = vadd.f32 %v706_v25, %v347_v32  ;;  %v390_v39 = vmul.f32 %v712_v34, %v343_v24  ;;  %713 = vrcp.f32 %v1036_v33  ;;  %vm395_vm9 = vweird.f32 %v712_v34  ;;  %vm366_vm11 = vmor %vm364_vm10, %vm365_vm8 }
 0x14c   : > { %v361_v40 = vsub.f32 1.0, %v360_v37  ;;  %vm396_vm13 = vmor %vm394_vm7, %vm395_vm9  ;;  %v383_v5 = vand.u32 2147483647, %v1036_v33  ;;  %vm379_vm0 = vweird.f32 %v1036_v33 }
 0x14d   : > { %v352_v42 = vsel %vm1038_vm5, %v706_v25, %v348_v38  ;;  %v391_v44 = vsub.f32 1.0, %v390_v39 }
 0x14e   : > { %v357_v45 = vsel %vm354_vm6, %v356_v36, %v352_v42  ;;  %v362_v46 = vmul.f32 %v710_v31, %v361_v40  ;;  %vm384_vm2 = vcmp.eq.f32.partialorder %v383_v5, 8.507059e+37 }
 0x14f   : > { %v404_v48 = vmul.f32 %v357_v45, %v1017_v3  ;;  %412 = vst [vmem:[%s1051_s19] sm:$0xff] %v357_v45  ;;  %v392_v49 = vmul.f32 %v712_v34, %v391_v44  ;;  %v385_v3 = vand.u32 2147483648, %v1036_v33 }
 0x150   : > { %v363_v51 = vadd.f32 %v710_v31, %v362_v46 }
 0x151   : > { %v714_v52 = vpop.eup %713  ;;  %408 = vst [vmem:[%s1056_s18] sm:$0xff] %v404_v48  ;;  %v393_v54 = vadd.f32 %v712_v34, %v392_v49 }
 0x152   : > { %v367_v55 = vsel %vm366_vm11, %v710_v31, %v363_v51  ;;  %v375_v57 = vmul.f32 %v714_v52, %v1036_v33  ;;  %vm380_vm15 = vweird.f32 %v714_v52 }
 0x153   : > { %v372_v58 = vsel %vm369_vm12, %v371_v53, %v367_v55  ;;  %v397_v59 = vsel %vm396_vm13, %v712_v34, %v393_v54  ;;  %vm381_vm1 = vmor %vm379_vm0, %vm380_vm15 }
 0x154   : > { %v405_v60 = vmul.f32 %v372_v58, %v1014_v2  ;;  %413 = vst [vmem:[%s1051_s19 + $0x8] sm:$0xff] %v372_v58  ;;  %v402_v61 = vsel %vm399_vm14, %v401_v56, %v397_v59  ;;  %v376_v62 = vsub.f32 1.0, %v375_v57 }
 0x155   : > { %v407_v63 = vmul.f32 %v402_v61, %v1009_v0  ;;  %415 = vst [vmem:[%s1051_s19 + $0x18] sm:$0xff] %v402_v61  ;;  %v386_v0 = vor.u32 1.1754944e-38, %v385_v3 }
 0x156   : > { %409 = vst [vmem:[%s1056_s18 + $0x8] sm:$0xff] %v405_v60  ;;  %v377_v4 = vmul.f32 %v714_v52, %v376_v62 }
 0x157   : > { %411 = vst [vmem:[%s1056_s18 + $0x18] sm:$0xff] %v407_v63 }
 0x158   : > { %v378_v2 = vadd.f32 %v714_v52, %v377_v4 }
 0x15a   : > { %v382_v6 = vsel %vm381_vm1, %v714_v52, %v378_v2 }
 0x15b   : > { %v387_v7 = vsel %vm384_vm2, %v386_v0, %v382_v6 }
 0x15c   : > { %v406_v8 = vmul.f32 %v387_v7, %v1011_v1  ;;  %414 = vst [vmem:[%s1051_s19 + $0x10] sm:$0xff] %v387_v7 }
 0x15d   : > { %772 = shalt.err (!%p769_p11)
}
 0x15e   : > { %s880_s19 = smov 128   ;;  %s881_s12 = smov 256   ;;  %410 = vst [vmem:[%s1056_s18 + $0x10] sm:$0xff] %v406_v8 }
 0x15f   : > { %s882_s17 = smov 8   ;;  %s417_s25 = scalar_lea.sflag [#allocation4], %s998_s11 }
 0x160   : > { %613 = dma.vmem_to_hbm [thread:$0]  (%p973_p9), %s454_s13, 512, %s456_s14, %s422_s23, %s880_s19, %s881_s12, %s882_s17  }
 0x161   : > { %s787_s30 = sshra.s32 %s1085_s10, 4  ;;  %s793_s7 = scalar_lea.hbm %s1144_s3, 128  ;;  %s788_s30 = int_to_ptr.hbm [resolvable:$true] %s787_s30 }
 0x162   : > { %s789_s6 = scalar_lea.hbm %s788_s30, 32  ;;  %p794_p2 = scmp.lt.s32.totalorder %s788_s30, %s1144_s3 }
 0x163   : > { %p790_p13 = scmp.ne.s32.totalorder %s788_s30, %s789_s6  ;;  %p795_p4 = scmp.lt.s32.totalorder %s793_s7, %s789_s6 }
 0x165   : > { %p791_p0 = pnand %p790_p13, %p973_p9  ;;  %p796_p3 = por %p795_p4, %p794_p2 }
 0x167   : > { %p792_p1 = pneg %p791_p0 }
 0x169   : > { %p797_p5 = pnand %p796_p3, %p792_p1 }
 0x16b   : > { %800 = shalt.err (!%p797_p5)
}
 0x16c   : > { %612 = dma.vmem_to_hbm [thread:$0]  (%p973_p9), %s1083_s9, 512, %s1085_s10, %s417_s25, %s880_s19, %s881_s12, %s882_s17  }
 0x16d PF: > { %p628_p6 = scmp.ge.s32.totalorder %s875_s22, 2  ;;  %s470_s11 = sand.u32 1, %s847_s15  }
 0x16e   : > { %s471_s18 = scalar_lea.sflag [#allocation4], %s470_s11 }
 0x16f   : > { %p621_p7 = pnand %p628_p6, %p979_p12 }
 0x171   : > { %p622_p8 = pneg %p621_p7 }
 0x173   : > { %838 = dma.done.wait (%p622_p8), %s471_s18, 512  }
 0x174   : > { %840 = vsyncadd (%p622_p8), %s471_s18, 4294966784  ;;  %s481_s13 = scalar_lea.sflag [#allocation7], %s470_s11 }
 0x175   : > { %842 = dma.done.wait (%p622_p8), %s481_s13, 512  }
 0x176   : > { %844 = vsyncadd (%p622_p8), %s481_s13, 4294966784  ;;  %s24_s22 = sadd.s32 1, %s875_s22   ;;  %s1159_s5 = sld [smem:[#allocation11_spill]] }
 0x177   : > { %p21_p10 = scmp.ge.s32.totalorder %s24_s22, 6   ;;  %s1160_s17 = sld [smem:[#allocation14_spill]] }
 0x178   : > { %s1161_s9 = sld [smem:[#allocation12_spill]]  ;;  %s1163_s15 = smov %s851_s16 }
 0x179   : > { %s1162_s10 = sld [smem:[#allocation13_spill]]  ;;  %s1165_s18 = smov %s867_s20 }
 0x17a   : > { %s1166_s19 = smov %s871_s21 }
 0x17b   :  { %23 = sbr.rel (!%p21_p10) target bundleno = 9 (0x9), region = 94 }
 0x17c   : > { %s1164_s16 = smov %s1159_s5 }
 0x17e   : > { %s1167_s20 = smov %s1161_s9 }
 0x17f   : > { %s1168_s21 = smov %s1162_s10 }
 0x180   :  { %487 = vsyncpa [#allocation3], 1 }
 0x181   :  { %489 = vsyncpa [#allocation3 + $0x1], 1 }
 0x182   :  { %490 = vsyncpa [#allocation4], 1 }
 0x183   :  { %492 = vsyncpa [#allocation4 + $0x1], 1 }
 0x184   :  { %493 = vsyncpa [#allocation7], 1 }
 0x185   :  { %495 = vsyncpa [#allocation7 + $0x1], 1 }

</bundles_post_ra>
